<compile_context>
chip_gen: v5e
topology: v5e:2x2
jax: 0.10.0
libtpu: 0.0.40
codegen_flags: <defaults>
</compile_context>

<pallas_src>
import jax
import jax.numpy as jnp
from jax.experimental import pallas as pl
from jax.experimental.pallas import tpu as pltpu


def pipeline_mlp_kernel(x_ref, w1_ref, b1_ref, w2_ref, b2_ref, o_ref):
    """One batch tile through both pipeline stages in one kernel invocation.

    Stage 0: Linear(H->H) + ReLU
    Stage 1: Linear(H->H) + ReLU
    """
    x = x_ref[...]  # f32 [TM, H]

    # --- pipeline stage 0 --- (bf16 MXU operands, f32 accumulation)
    h = jnp.dot(x.astype(jnp.bfloat16), w1_ref[...],
                preferred_element_type=jnp.float32)
    h = jnp.maximum(h + b1_ref[...], 0.0)          # bias (1,H) broadcast + ReLU, f32

    # --- pipeline stage 1 ---
    y = jnp.dot(h.astype(jnp.bfloat16), w2_ref[...],
                preferred_element_type=jnp.float32)
    y = jnp.maximum(y + b2_ref[...], 0.0)

    o_ref[...] = y.astype(o_ref.dtype)


def pipeline_parallel_forward(x, w1, b1, w2, b2, *, chunks=8, tile_m=512):
    """Equivalent of PipelineParallel.forward (micro-batch -> stages -> concat).

    Micro-batching + concat along dim 0 is identity-preserving, so the batch
    is processed as lane-dense row blocks:
      * B >= 1024 (and divisible by tile_m): grid over batch rows, weights
        resident, "parallel" semantics -> both v7x TensorCores get work and
        the per-tile x/out DMAs overlap with the back-to-back matmuls.
      * small B (toy size): a single gridless invocation, fully VMEM resident.
    """
    B, H = x.shape
    assert B % chunks == 0, "batch must be divisible by chunks"

    if B >= 1024 and B % tile_m == 0:
        # ---- batch-tiled path (scaled B; v7x megacore + pipelined x/out) ----
        grid = (B // tile_m,)
        in_specs = [
            pl.BlockSpec((tile_m, H), lambda i: (i, 0)),   # x: tiled, double-buffered
            pl.BlockSpec(w1.shape, lambda i: (0, 0)),      # weights: resident, DMA'd once
            pl.BlockSpec(b1.shape, lambda i: (0, 0)),
            pl.BlockSpec(w2.shape, lambda i: (0, 0)),
            pl.BlockSpec(b2.shape, lambda i: (0, 0)),
        ]
        out_specs = pl.BlockSpec((tile_m, H), lambda i: (i, 0))
        return pl.pallas_call(
            pipeline_mlp_kernel,
            out_shape=jax.ShapeDtypeStruct((B, H), x.dtype),
            grid=grid,
            in_specs=in_specs,
            out_specs=out_specs,
            compiler_params=pltpu.CompilerParams(
                dimension_semantics=("parallel",)),
        )(x, w1, b1, w2, b2)

    # ---- gridless path (toy size): everything resident in VMEM, no pipelining ----
    vmem_spec = pl.BlockSpec(memory_space=pltpu.MemorySpace.VMEM)
    return pl.pallas_call(
        pipeline_mlp_kernel,
        out_shape=jax.ShapeDtypeStruct((B, H), x.dtype),
        in_specs=[vmem_spec] * 5,
        out_specs=vmem_spec,
    )(x, w1, b1, w2, b2)


def reference_forward(x, w1, b1, w2, b2):
    """Pure-JAX reference with matching numerics (bf16 operands, f32 accum)."""
    h = jnp.maximum(
        jnp.dot(x.astype(jnp.bfloat16), w1, preferred_element_type=jnp.float32) + b1,
        0.0)
    y = jnp.maximum(
        jnp.dot(h.astype(jnp.bfloat16), w2, preferred_element_type=jnp.float32) + b2,
        0.0)
    return y


if __name__ == "__main__":
    key = jax.random.PRNGKey(0)
    k_x, k_w1, k_b1, k_w2, k_b2, k_x2 = jax.random.split(key, 6)

    BATCH = 64       # divisible by chunks=8 and >= num_devices=2
    HIDDEN = 128     # lane-dense (multiple of 128)
    CHUNKS = 8

    x = jax.random.normal(k_x, (BATCH, HIDDEN), dtype=jnp.float32)
    # Linear weights stored as [in, out]; cast to bf16 ONCE at init (MXU operands).
    w1 = (jax.random.normal(k_w1, (HIDDEN, HIDDEN), dtype=jnp.float32) * 0.1).astype(jnp.bfloat16)
    b1 = jax.random.normal(k_b1, (1, HIDDEN), dtype=jnp.float32) * 0.1
    w2 = (jax.random.normal(k_w2, (HIDDEN, HIDDEN), dtype=jnp.float32) * 0.1).astype(jnp.bfloat16)
    b2 = jax.random.normal(k_b2, (1, HIDDEN), dtype=jnp.float32) * 0.1

    # --- toy size: gridless, fully VMEM-resident path ---
    out = pipeline_parallel_forward(x, w1, b1, w2, b2, chunks=CHUNKS)
    out = jax.block_until_ready(out)
    ref = reference_forward(x, w1, b1, w2, b2)
    assert out.shape == (BATCH, HIDDEN)
    assert jnp.allclose(out, ref, atol=1e-3, rtol=1e-3), "mismatch vs reference (small)"

    # --- scaled batch: tiled path (grid over rows, weights resident, megacore) ---
    BIG_BATCH = 1024
    x2 = jax.random.normal(k_x2, (BIG_BATCH, HIDDEN), dtype=jnp.float32)
    out2 = pipeline_parallel_forward(x2, w1, b1, w2, b2, chunks=CHUNKS)
    out2 = jax.block_until_ready(out2)
    ref2 = reference_forward(x2, w1, b1, w2, b2)
    assert out2.shape == (BIG_BATCH, HIDDEN)
    assert jnp.allclose(out2, ref2, atol=1e-3, rtol=1e-3), "mismatch vs reference (tiled)"

    # TODO(synk): true multi-device pipeline scheduling (cross-device transfers,
    # cuda:i placement) has no single-kernel equivalent; stages run back-to-back
    # per batch tile on one TensorCore, which preserves the forward math exactly.
    print("KERNEL_OK")
</pallas_src>

<mosaic_0001>
module attributes {stable_mosaic.version = 11 : i64} {
  func.func @pipeline_mlp_kernel(%arg0: memref<64x128xf32, #tpu.memory_space<vmem>>, %arg1: memref<128x128xbf16, #tpu.memory_space<vmem>>, %arg2: memref<1x128xf32, #tpu.memory_space<vmem>>, %arg3: memref<128x128xbf16, #tpu.memory_space<vmem>>, %arg4: memref<1x128xf32, #tpu.memory_space<vmem>>, %arg5: memref<64x128xf32, #tpu.memory_space<vmem>>) attributes {dimension_semantics = [], scalar_prefetch = 0 : i64, scratch_operands = 0 : i64, tpu.core_type = #tpu.core_type<tc>} {
    %c0 = arith.constant 0 : index
    %c0_0 = arith.constant 0 : index
    %0 = vector.load %arg0[%c0, %c0_0] : memref<64x128xf32, #tpu.memory_space<vmem>>, vector<64x128xf32>
    %1 = arith.truncf %0 : vector<64x128xf32> to vector<64x128xbf16>
    %c0_1 = arith.constant 0 : index
    %c0_2 = arith.constant 0 : index
    %2 = vector.load %arg1[%c0_1, %c0_2] : memref<128x128xbf16, #tpu.memory_space<vmem>>, vector<128x128xbf16>
    %cst = arith.constant dense<0.000000e+00> : vector<64x128xf32>
    %3 = tpu.matmul %1, %2, %cst {dimension_numbers = #tpu.dot_dimension_numbers<[1], [0], [0], [1], [0, 0, 1, 1], [], []>} : vector<64x128xbf16>, vector<128x128xbf16>, vector<64x128xf32> -> vector<64x128xf32>
    %c0_3 = arith.constant 0 : index
    %c0_4 = arith.constant 0 : index
    %4 = vector.load %arg2[%c0_3, %c0_4] : memref<1x128xf32, #tpu.memory_space<vmem>>, vector<1x128xf32>
    %5 = vector.broadcast %4 : vector<1x128xf32> to vector<64x128xf32>
    %6 = arith.addf %3, %5 : vector<64x128xf32>
    %cst_5 = arith.constant 0.000000e+00 : f32
    %7 = vector.broadcast %cst_5 : f32 to vector<64x128xf32>
    %8 = arith.maximumf %6, %7 : vector<64x128xf32>
    %9 = arith.truncf %8 : vector<64x128xf32> to vector<64x128xbf16>
    %c0_6 = arith.constant 0 : index
    %c0_7 = arith.constant 0 : index
    %10 = vector.load %arg3[%c0_6, %c0_7] : memref<128x128xbf16, #tpu.memory_space<vmem>>, vector<128x128xbf16>
    %cst_8 = arith.constant dense<0.000000e+00> : vector<64x128xf32>
    %11 = tpu.matmul %9, %10, %cst_8 {dimension_numbers = #tpu.dot_dimension_numbers<[1], [0], [0], [1], [0, 0, 1, 1], [], []>} : vector<64x128xbf16>, vector<128x128xbf16>, vector<64x128xf32> -> vector<64x128xf32>
    %c0_9 = arith.constant 0 : index
    %c0_10 = arith.constant 0 : index
    %12 = vector.load %arg4[%c0_9, %c0_10] : memref<1x128xf32, #tpu.memory_space<vmem>>, vector<1x128xf32>
    %13 = vector.broadcast %12 : vector<1x128xf32> to vector<64x128xf32>
    %14 = arith.addf %11, %13 : vector<64x128xf32>
    %cst_11 = arith.constant 0.000000e+00 : f32
    %15 = vector.broadcast %cst_11 : f32 to vector<64x128xf32>
    %16 = arith.maximumf %14, %15 : vector<64x128xf32>
    %c0_12 = arith.constant 0 : index
    %c0_13 = arith.constant 0 : index
    %17 = vector.load %arg5[%c0_12, %c0_13] : memref<64x128xf32, #tpu.memory_space<vmem>>, vector<64x128xf32>
    tpu.vector_store %arg5[%c0_12, %c0_13], %16 {strides = array<i32>} : memref<64x128xf32, #tpu.memory_space<vmem>>, vector<64x128xf32>,
    return
  }
}

</mosaic_0001>

<bundles_post_ra>
// kernel: tpu_custom_call.1
= control target key start
LH: loop header
LB: loop body
LE: loop exit
PB: predicated region body
PF: predicated region fallthrough
CT: control target
= control target key end

     0   :  { %10 = vsyncpa [#allocation3], 0  ;;  %s592_s0 = inlined_call_operand.hbm [shape: f32[64,128], index: 0, kind: input, shape index: {}]   ;;  %s593_s1 = inlined_call_operand.hbm [shape: bf16[128,128], index: 1, kind: input, shape index: {}]   ;;  %s594_s2 = inlined_call_operand.vmem [shape: f32[1,128], index: 2, kind: input, shape index: {}]   ;;  %s595_s3 = inlined_call_operand.hbm [shape: bf16[128,128], index: 3, kind: input, shape index: {}]   ;;  %s596_s4 = inlined_call_operand.vmem [shape: f32[1,128], index: 4, kind: input, shape index: {}]   ;;  %s597_s5 = inlined_call_operand.hbm [shape: f32[64,128], index: 5, kind: output, shape index: {}]  }
   0x1   :  { %11 = vsyncpa [#allocation6], 0  ;;  %s30_s20 = sshll.u32 %s593_s1, 4  ;;  %s31_s20 = int_to_ptr.hbm [resolvable:$true] %s30_s20 }
   0x2   :  { %12 = vsyncpa [#allocation4], 0  ;;  %s530_s21 = smov [#allocation5]   ;;  %s17_s25 = sshll.u32 %s592_s0, 4  ;;  %s18_s25 = int_to_ptr.hbm [resolvable:$true] %s17_s25 }
   0x3   :  { %s32_s22 = sshll.u32 %s530_s21, 4  ;;  %s531_s26 = smov 64   ;;  %s33_s22 = int_to_ptr.vmem [resolvable:$true] %s32_s22 }
   0x4   :  { %s532_s27 = smov 4   ;;  %s533_s28 = smov [#allocation2]  }
   0x5   :  { %38 = dma.hbm_to_vmem [thread:$0]  %s31_s20, 1024, %s33_s22, [#allocation6], %s531_s26, %s531_s26, %s532_s27  }
   0x6   :  { %s19_s29 = sshll.u32 %s533_s28, 4  ;;  %s534_s30 = smov 128   ;;  %s20_s29 = int_to_ptr.vmem [resolvable:$true] %s19_s29 }
   0x7   :  { %s535_s6 = smov 8   ;;  %s45_s8 = sshll.u32 %s595_s3, 4  ;;  %s46_s8 = int_to_ptr.hbm [resolvable:$true] %s45_s8 }
   0x8   :  { %25 = dma.hbm_to_vmem [thread:$0]  %s18_s25, 1024, %s20_s29, [#allocation3], %s534_s30, %s534_s30, %s535_s6  }
   0x9   :  { %s536_s9 = smov [#allocation7]  }
   0xa   :  { %s47_s0 = sshll.u32 %s536_s9, 4  ;;  %s48_s0 = int_to_ptr.vmem [resolvable:$true] %s47_s0 }
   0xb   :  { %53 = dma.hbm_to_vmem [thread:$0]  %s46_s8, 1024, %s48_s0, [#allocation6], %s531_s26, %s531_s26, %s532_s27  }
   0xc   :  { %524 = dma.done.wait [#allocation3], 1024  }
   0xd   :  { %525 = vsyncadd [#allocation3], 4294966272 }
   0xe   :  { %526 = dma.done.wait [#allocation6], 2048  }
   0xf   :  { %527 = vsyncadd [#allocation6], 4294965248  ;;  %v393_v0 = vld [vmem:[#allocation5 + $0x38] sm:$0xff]  ;;  %v392_v1 = vld [vmem:[#allocation5 + $0x30] sm:$0xff]  ;;  %s308_s15 = sshll.u32 %s597_s5, 4  ;;  %s309_s15 = int_to_ptr.hbm [resolvable:$true] %s308_s15 }
  0x10   :  { %148 = vmatpush.bf16.msra.mxu0 %v393_v0  ;;  %402 = vmatpush.bf16.msra.mxu2 %v393_v0  ;;  %v391_v2 = vld [vmem:[#allocation5 + $0x28] sm:$0xff]  ;;  %v390_v3 = vld [vmem:[#allocation5 + $0x20] sm:$0xff]  ;;  %v389_v4 = vld [vmem:[#allocation5 + $0x18] sm:$0xff] }
  0x11   :  { %v401_v5 = vld [vmem:[#allocation7 + $0x38] sm:$0xff]  ;;  %v388_v6 = vld [vmem:[#allocation5 + $0x10] sm:$0xff]  ;;  %v387_v8 = vld [vmem:[#allocation5 + $0x8] sm:$0xff] }
  0x12   :  { %257 = vmatpush.bf16.msra.mxu1 %v401_v5  ;;  %v400_v7 = vld [vmem:[#allocation7 + $0x30] sm:$0xff]  ;;  %410 = vmatpush.bf16.msra.mxu3 %v401_v5  ;;  %v399_v9 = vld [vmem:[#allocation7 + $0x28] sm:$0xff]  ;;  %v386_v10 = vld [vmem:[#allocation5] sm:$0xff] }
  0x13   :  { %v68_v11 = vld [vmem:[#allocation2] sm:$0xff]  ;;  %v69_v12 = vld [vmem:[#allocation2 + $0x8] sm:$0xff]  ;;  %v70_v18 = vld [vmem:[#allocation2 + $0x10] sm:$0xff] }
  0x14   :  { %149 = vmatpush.bf16.msra.mxu0 %v392_v1  ;;  %403 = vmatpush.bf16.msra.mxu2 %v392_v1  ;;  %v72_v13 = vld [vmem:[#allocation2 + $0x20] sm:$0xff]  ;;  %v73_v14 = vld [vmem:[#allocation2 + $0x28] sm:$0xff]  ;;  %v76_v16 = vpack.c.bf16 %v69_v12, %v68_v11  ;;  %v71_v19 = vld [vmem:[#allocation2 + $0x18] sm:$0xff] }
  0x15   :  { %v398_v15 = vld [vmem:[#allocation7 + $0x20] sm:$0xff]  ;;  %v78_v17 = vpack.c.bf16 %v73_v14, %v72_v13  ;;  %v74_v20 = vld [vmem:[#allocation2 + $0x30] sm:$0xff]  ;;  %v75_v21 = vld [vmem:[#allocation2 + $0x38] sm:$0xff]  ;;  %v77_v22 = vpack.c.bf16 %v71_v19, %v70_v18 }
  0x16   :  { %258 = vmatpush.bf16.msra.mxu1 %v400_v7  ;;  %411 = vmatpush.bf16.msra.mxu3 %v400_v7  ;;  %v79_v23 = vpack.c.bf16 %v75_v21, %v74_v20  ;;  %v397_v24 = vld [vmem:[#allocation7 + $0x18] sm:$0xff]  ;;  %v396_v25 = vld [vmem:[#allocation7 + $0x10] sm:$0xff]  ;;  %v395_v26 = vld [vmem:[#allocation7 + $0x8] sm:$0xff] }
  0x17   :  { %v394_v27 = vld [vmem:[#allocation7] sm:$0xff] }
  0x18   :  { %150 = vmatpush.bf16.msra.mxu0 %v391_v2  ;;  %404 = vmatpush.bf16.msra.mxu2 %v391_v2  ;;  %v426_v29 = vld [vmem:[%s594_s2] ss:$0 sm:$0xff] }
  0x19   :  { %v427_v57 = vld [vmem:[%s596_s4] ss:$0 sm:$0xff]  ;;  %s537_s4 = smov [#allocation8]  }
  0x1a   :  { %259 = vmatpush.bf16.msra.mxu1 %v399_v9  ;;  %412 = vmatpush.bf16.msra.mxu3 %v399_v9  ;;  %s306_s12 = sshll.u32 %s537_s4, 4  ;;  %s307_s12 = int_to_ptr.vmem [resolvable:$true] %s306_s12 }
  0x1c   :  { %151 = vmatpush.bf16.msra.mxu0 %v390_v3  ;;  %405 = vmatpush.bf16.msra.mxu2 %v390_v3 }
  0x1e   :  { %260 = vmatpush.bf16.msra.mxu1 %v398_v15  ;;  %413 = vmatpush.bf16.msra.mxu3 %v398_v15 }
  0x20   :  { %152 = vmatpush.bf16.msra.mxu0 %v389_v4  ;;  %406 = vmatpush.bf16.msra.mxu2 %v389_v4 }
  0x22   :  { %261 = vmatpush.bf16.msra.mxu1 %v397_v24  ;;  %414 = vmatpush.bf16.msra.mxu3 %v397_v24 }
  0x24   :  { %153 = vmatpush.bf16.msra.mxu0 %v388_v6  ;;  %407 = vmatpush.bf16.msra.mxu2 %v388_v6 }
  0x26   :  { %262 = vmatpush.bf16.msra.mxu1 %v396_v25  ;;  %415 = vmatpush.bf16.msra.mxu3 %v396_v25 }
  0x28   :  { %154 = vmatpush.bf16.msra.mxu0 %v387_v8  ;;  %408 = vmatpush.bf16.msra.mxu2 %v387_v8 }
  0x2a   :  { %263 = vmatpush.bf16.msra.mxu1 %v395_v26  ;;  %416 = vmatpush.bf16.msra.mxu3 %v395_v26 }
  0x2c   :  { %155 = vmatpush.bf16.msra.mxu0 %v386_v10  ;;  %409 = vmatpush.bf16.msra.mxu2 %v386_v10 }
  0x2e   :  { %264 = vmatpush.bf16.msra.mxu1 %v394_v27  ;;  %417 = vmatpush.bf16.msra.mxu3 %v394_v27 }
  0x2f   :  { %156 = vmatmul.bf16.vlgmr.msra.gmra.mxu0 %v76_v16  ;;  %166 = vmatmul.bf16.vlgmr.msra.gmra.mxu2 %v78_v17 }
  0x3f   :  { %161 = vmatmul.bf16.gmra.mxu0 %v77_v22  ;;  %171 = vmatmul.bf16.gmra.mxu2 %v79_v23 }
  0xac   :  { %v157_v28 = vpop.f32.mrf.mxu0 }
  0xad   :  { %v158_v30 = vadd.f32 %v426_v29, %v157_v28 }
  0xaf   :  { %v177_v33 = vmax.f32 %v158_v30, 0.0 }
  0xb2   :  { %v167_v31 = vpop.f32.mrf.mxu2 }
  0xb3   :  { %v168_v36 = vadd.f32 %v426_v29, %v167_v31 }
  0xb4   :  { %v159_v32 = vpop.f32.mrf.mxu0 }
  0xb5   :  { %v160_v34 = vadd.f32 %v426_v29, %v159_v32  ;;  %v181_v41 = vmax.f32 %v168_v36, 0.0 }
  0xb7   :  { %v178_v35 = vmax.f32 %v160_v34, 0.0 }
  0xb9   :  { %v185_v37 = vpack.c.bf16 %v178_v35, %v177_v33 }
  0xba   :  { %v169_v38 = vpop.f32.mrf.mxu2 }
  0xbb   :  { %v170_v39 = vadd.f32 %v426_v29, %v169_v38  ;;  %265 = vmatmul.bf16.vlgmr.msra.gmra.mxu1 %v185_v37 }
  0xbc   :  { %v162_v40 = vpop.f32.mrf.mxu0 }
  0xbd   :  { %v182_v42 = vmax.f32 %v170_v39, 0.0  ;;  %v163_v44 = vadd.f32 %v426_v29, %v162_v40 }
  0xbf   :  { %v187_v43 = vpack.c.bf16 %v182_v42, %v181_v41  ;;  %v179_v47 = vmax.f32 %v163_v44, 0.0 }
  0xc1   :  { %275 = vmatmul.bf16.vlgmr.msra.gmra.mxu3 %v187_v43 }
  0xc2   :  { %v172_v45 = vpop.f32.mrf.mxu2 }
  0xc3   :  { %v173_v50 = vadd.f32 %v426_v29, %v172_v45 }
  0xc4   :  { %v164_v46 = vpop.f32.mrf.mxu0 }
  0xc5   :  { %v165_v48 = vadd.f32 %v426_v29, %v164_v46  ;;  %v183_v54 = vmax.f32 %v173_v50, 0.0 }
  0xc7   :  { %v180_v49 = vmax.f32 %v165_v48, 0.0 }
  0xc9   :  { %v186_v51 = vpack.c.bf16 %v180_v49, %v179_v47 }
  0xca   :  { %v174_v52 = vpop.f32.mrf.mxu2 }
  0xcb   :  { %v175_v53 = vadd.f32 %v426_v29, %v174_v52  ;;  %270 = vmatmul.bf16.gmra.mxu1 %v186_v51 }
  0xcd   :  { %v184_v55 = vmax.f32 %v175_v53, 0.0 }
  0xcf   :  { %v188_v56 = vpack.c.bf16 %v184_v55, %v183_v54 }
  0xd1   :  { %280 = vmatmul.bf16.gmra.mxu3 %v188_v56 }
 0x138   :  { %v266_v58 = vpop.f32.mrf.mxu1 }
 0x139   :  { %v267_v59 = vadd.f32 %v427_v57, %v266_v58 }
 0x13b   :  { %v286_v60 = vmax.f32 %v267_v59, 0.0 }
 0x13d   :  { %294 = vst [vmem:[#allocation8] sm:$0xff] %v286_v60 }
 0x140   :  { %v268_v61 = vpop.f32.mrf.mxu1 }
 0x141   :  { %v269_v62 = vadd.f32 %v427_v57, %v268_v61 }
 0x143   :  { %v287_v63 = vmax.f32 %v269_v62, 0.0 }
 0x144   :  { %v276_v0 = vpop.f32.mrf.mxu3 }
 0x145   :  { %295 = vst [vmem:[#allocation8 + $0x8] sm:$0xff] %v287_v63  ;;  %v277_v1 = vadd.f32 %v427_v57, %v276_v0 }
 0x147   :  { %v290_v2 = vmax.f32 %v277_v1, 0.0 }
 0x148   :  { %v271_v3 = vpop.f32.mrf.mxu1 }
 0x149   :  { %298 = vst [vmem:[#allocation8 + $0x20] sm:$0xff] %v290_v2  ;;  %v272_v4 = vadd.f32 %v427_v57, %v271_v3 }
 0x14b   :  { %v288_v5 = vmax.f32 %v272_v4, 0.0 }
 0x14c   :  { %v278_v6 = vpop.f32.mrf.mxu3 }
 0x14d   :  { %296 = vst [vmem:[#allocation8 + $0x10] sm:$0xff] %v288_v5  ;;  %v279_v7 = vadd.f32 %v427_v57, %v278_v6 }
 0x14f   :  { %v291_v8 = vmax.f32 %v279_v7, 0.0 }
 0x150   :  { %v273_v9 = vpop.f32.mrf.mxu1 }
 0x151   :  { %299 = vst [vmem:[#allocation8 + $0x28] sm:$0xff] %v291_v8  ;;  %v274_v10 = vadd.f32 %v427_v57, %v273_v9 }
 0x153   :  { %v289_v11 = vmax.f32 %v274_v10, 0.0 }
 0x154   :  { %v281_v12 = vpop.f32.mrf.mxu3 }
 0x155   :  { %297 = vst [vmem:[#allocation8 + $0x18] sm:$0xff] %v289_v11  ;;  %v282_v13 = vadd.f32 %v427_v57, %v281_v12 }
 0x157   :  { %v292_v14 = vmax.f32 %v282_v13, 0.0 }
 0x159   :  { %300 = vst [vmem:[#allocation8 + $0x30] sm:$0xff] %v292_v14 }
 0x15c   :  { %v283_v15 = vpop.f32.mrf.mxu3 }
 0x15d   :  { %v284_v16 = vadd.f32 %v427_v57, %v283_v15 }
 0x15f   :  { %v293_v17 = vmax.f32 %v284_v16, 0.0 }
 0x161   :  { %301 = vst [vmem:[#allocation8 + $0x38] sm:$0xff] %v293_v17 }
 0x162   :  { %314 = dma.vmem_to_hbm [thread:$0]  %s307_s12, 1024, %s309_s15, [#allocation4], %s534_s30, %s534_s30, %s535_s6  }
 0x163   :  { %528 = dma.done.wait [#allocation4], 1024  }
 0x164   :  { %529 = vsyncadd [#allocation4], 4294966272 }
 0x165   :  { %319 = vsyncpa [#allocation3], 1 }
 0x166   :  { %320 = vsyncpa [#allocation6], 1 }
 0x167   :  { %321 = vsyncpa [#allocation4], 1 }

</bundles_post_ra>
